<compile_context>
chip_gen: v7x
topology: tpu7x:2x2x1
jax: 0.10.0
libtpu: 0.0.40
codegen_flags: <defaults>
</compile_context>

<pallas_src>
import jax
import jax.numpy as jnp
from jax.experimental import pallas as pl
from jax.experimental.pallas import tpu as pltpu


H1 = 256
H2 = 64


def _round_up(n, m):
    return ((n + m - 1) // m) * m


def _mlp_kernel(x_ref, w1_ref, c1_ref, w2_ref, c2_ref, w3_ref, b3_ref, o_ref):
    # Layer 1: Linear(D,256) with BN+bias folded into (w1, c1); bf16 MXU, f32 acc.
    h1 = jnp.dot(x_ref[...], w1_ref[...], preferred_element_type=jnp.float32)
    h1 = h1 + c1_ref[...]
    h1 = jnp.where(h1 > 0, h1, 0.1 * h1)          # LeakyReLU(0.1), f32 on VPU
    # Dropout(0.5): identity in eval mode.

    # Layer 2: Linear(256,64) with BN+bias folded into (w2, c2).
    h2 = jnp.dot(h1.astype(jnp.bfloat16), w2_ref[...],
                 preferred_element_type=jnp.float32)
    h2 = h2 + c2_ref[...]
    h2 = jnp.where(h2 > 0, h2, 0.1 * h2)          # LeakyReLU(0.1)
    # Dropout(0.5): identity in eval mode.

    # Layer 3: Linear(64, 1). N=1 matmul wastes the MXU -> VPU multiply +
    # lane reduction (XLU), plus scalar bias from SMEM.
    logit = jnp.sum(h2 * w3_ref[...], axis=-1) + b3_ref[0]      # (tb,)
    o_ref[...] = logit[None, :].astype(o_ref.dtype)             # lane-dense (1, tb)


def covid_classifier_forward(x, folded_params, *, tb=256):
    """x: [B, D] float32 -> logits [B] float32 (matches squeeze(1))."""
    w1f, c1, w2f, c2, w3row, b3 = folded_params
    B, D = x.shape
    h1, h2 = w1f.shape[1], w2f.shape[1]

    # Lane-align the feature dim (zero-pad x cols and W1 rows: exact, no effect).
    Dp = _round_up(D, 128)
    if Dp != D:
        x = jnp.pad(x, ((0, 0), (0, Dp - D)))
        w1f = jnp.pad(w1f, ((0, Dp - D), (0, 0)))

    # Batch tile: multiple of 128 (fills MXU rows, amortizes ~0.35us/step grid
    # overhead) but never larger than the padded batch. On v7x, large B keeps
    # the parallel grid >= 2 steps so both TensorCores are used.
    tb = max(128, _round_up(tb, 128))
    tb = min(tb, _round_up(B, 128))
    Bp = _round_up(B, tb)
    if Bp != B:
        x = jnp.pad(x, ((0, Bp - B), (0, 0)))

    # bf16 MXU operands (halves HBM traffic on the dominant x stream); the
    # folded biases / w3 row stay f32 for the VPU.
    x_bf = x.astype(jnp.bfloat16)
    w1_bf = w1f.astype(jnp.bfloat16)
    w2_bf = w2f.astype(jnp.bfloat16)

    const = lambda i: (0, 0)   # weights: single resident block

    out = pl.pallas_call(
        _mlp_kernel,
        out_shape=jax.ShapeDtypeStruct((1, Bp), jnp.float32),
        grid_spec=pltpu.PrefetchScalarGridSpec(
            num_scalar_prefetch=0,
            grid=(Bp // tb,),
            in_specs=[
                pl.BlockSpec((tb, Dp), lambda i: (i, 0)),   # x tile (streamed)
                pl.BlockSpec((Dp, h1), const),              # W1 (BN-folded, bf16)
                pl.BlockSpec((1, h1), const),               # c1 = b1*s1 + t1
                pl.BlockSpec((h1, h2), const),              # W2 (BN-folded, bf16)
                pl.BlockSpec((1, h2), const),               # c2 = b2*s2 + t2
                pl.BlockSpec((1, h2), const),               # w3 as a row vector
                pl.BlockSpec(memory_space=pltpu.MemorySpace.SMEM),  # b3 scalar
            ],
            out_specs=pl.BlockSpec((1, tb), lambda i: (0, i)),   # lane-dense logits
        ),
        compiler_params=pltpu.CompilerParams(
            dimension_semantics=("parallel",),
            vmem_limit_bytes=32 * 1024 * 1024,
        ),
    )(x_bf, w1_bf, c1, w2_bf, c2, w3row, b3)

    return out[0, :B]   # drop batch padding; squeeze(1) equivalent


# ---------------------------------------------------------------------------
# Parameter construction (PyTorch-style init) and host-side folding.
# ---------------------------------------------------------------------------

def init_raw_params(input_dim, key):
    """PyTorch defaults: Linear U(-1/sqrt(fan_in), +1/sqrt(fan_in));
    BatchNorm1d gamma=1, beta=0, running_mean=0, running_var=1."""
    ks = jax.random.split(key, 6)

    def linear(kw, kb, fan_in, fan_out):
        bound = 1.0 / float(fan_in) ** 0.5
        w = jax.random.uniform(kw, (fan_in, fan_out), jnp.float32, -bound, bound)
        b = jax.random.uniform(kb, (fan_out,), jnp.float32, -bound, bound)
        return w, b

    def bn(n):
        return (jnp.ones((n,), jnp.float32),    # gamma
                jnp.zeros((n,), jnp.float32),   # beta
                jnp.zeros((n,), jnp.float32),   # running_mean
                jnp.ones((n,), jnp.float32))    # running_var

    w1, b1 = linear(ks[0], ks[1], input_dim, H1)
    w2, b2 = linear(ks[2], ks[3], H1, H2)
    w3, b3 = linear(ks[4], ks[5], H2, 1)
    return dict(w1=w1, b1=b1, bn1=bn(H1), w2=w2, b2=b2, bn2=bn(H2), w3=w3, b3=b3)


def fold_params(raw, eps=1e-5):
    """Fold eval-mode BatchNorm and the Linear bias into the weights:
    (x@W + b)*s + t == x@(W*s) + (b*s + t)."""
    def fold_linear_bn(w, b, bn_buf):
        gamma, beta, rmean, rvar = bn_buf
        scale = gamma / jnp.sqrt(rvar + eps)
        shift = beta - rmean * scale
        wf = w * scale[None, :]
        c = (b * scale + shift)[None, :]
        return wf, c

    w1f, c1 = fold_linear_bn(raw["w1"], raw["b1"], raw["bn1"])
    w2f, c2 = fold_linear_bn(raw["w2"], raw["b2"], raw["bn2"])
    w3row = raw["w3"].T                     # (1, H2)
    b3 = raw["b3"].reshape((1,))            # scalar bias -> SMEM
    return (w1f, c1, w2f, c2, w3row, b3)


def reference_forward(x, folded_params):
    """Pure-JAX reference with the same numerics (bf16 MXU operands, f32 acc)."""
    w1f, c1, w2f, c2, w3row, b3 = folded_params
    bf = jnp.bfloat16
    h1 = jnp.dot(x.astype(bf), w1f.astype(bf),
                 preferred_element_type=jnp.float32) + c1
    h1 = jnp.where(h1 > 0, h1, 0.1 * h1)
    h2 = jnp.dot(h1.astype(bf), w2f.astype(bf),
                 preferred_element_type=jnp.float32) + c2
    h2 = jnp.where(h2 > 0, h2, 0.1 * h2)
    return jnp.sum(h2 * w3row, axis=-1) + b3[0]


if __name__ == "__main__":
    key = jax.random.PRNGKey(0)
    kx, kp = jax.random.split(key)

    B, INPUT_DIM = 16, 32
    x = jax.random.normal(kx, (B, INPUT_DIM), jnp.float32)

    raw = init_raw_params(INPUT_DIM, kp)
    folded = fold_params(raw)

    out = covid_classifier_forward(x, folded, tb=256)
    out = jax.block_until_ready(out)

    ref = reference_forward(x, folded)
    assert out.shape == (B,)
    assert jnp.allclose(out, ref, atol=1e-3, rtol=1e-3)

    print("KERNEL_OK")
</pallas_src>

<mosaic_0001>
module attributes {stable_mosaic.version = 11 : i64} {
  func.func @_mlp_kernel(%arg0: i32, %arg1: memref<128x128xbf16, #tpu.memory_space<vmem>>, %arg2: memref<128x256xbf16, #tpu.memory_space<vmem>>, %arg3: memref<1x256xf32, #tpu.memory_space<vmem>>, %arg4: memref<256x64xbf16, #tpu.memory_space<vmem>>, %arg5: memref<1x64xf32, #tpu.memory_space<vmem>>, %arg6: memref<1x64xf32, #tpu.memory_space<vmem>>, %arg7: memref<1xf32, #tpu.memory_space<smem>>, %arg8: memref<1x128xf32, #tpu.memory_space<vmem>>) attributes {dimension_semantics = [#tpu.dimension_semantics<parallel>], iteration_bounds = array<i64: 1>, scalar_prefetch = 0 : i64, scratch_operands = 0 : i64, tpu.core_type = #tpu.core_type<tc>, window_params = [{transform_indices = @transform_0, window_bounds = array<i64: 128, 128>}, {pipeline_mode = #tpu.pipeline_mode<synchronous>, transform_indices = @transform_1, window_bounds = array<i64: 128, 256>}, {pipeline_mode = #tpu.pipeline_mode<synchronous>, transform_indices = @transform_2, window_bounds = array<i64: 1, 256>}, {pipeline_mode = #tpu.pipeline_mode<synchronous>, transform_indices = @transform_3, window_bounds = array<i64: 256, 64>}, {pipeline_mode = #tpu.pipeline_mode<synchronous>, transform_indices = @transform_4, window_bounds = array<i64: 1, 64>}, {pipeline_mode = #tpu.pipeline_mode<synchronous>, transform_indices = @transform_5, window_bounds = array<i64: 1, 64>}, {transform_indices = @transform_6, window_bounds = array<i64: 1>}, {transform_indices = @transform_7, window_bounds = array<i64: 1, 128>}]} {
    %c0 = arith.constant 0 : index
    %c0_0 = arith.constant 0 : index
    %0 = vector.load %arg1[%c0, %c0_0] : memref<128x128xbf16, #tpu.memory_space<vmem>>, vector<128x128xbf16>
    %c0_1 = arith.constant 0 : index
    %c0_2 = arith.constant 0 : index
    %1 = vector.load %arg2[%c0_1, %c0_2] : memref<128x256xbf16, #tpu.memory_space<vmem>>, vector<128x256xbf16>
    %cst = arith.constant dense<0.000000e+00> : vector<128x256xf32>
    %2 = tpu.matmul %0, %1, %cst {dimension_numbers = #tpu.dot_dimension_numbers<[1], [0], [0], [1], [0, 0, 1, 1], [], []>} : vector<128x128xbf16>, vector<128x256xbf16>, vector<128x256xf32> -> vector<128x256xf32>
    %c0_3 = arith.constant 0 : index
    %c0_4 = arith.constant 0 : index
    %3 = vector.load %arg3[%c0_3, %c0_4] : memref<1x256xf32, #tpu.memory_space<vmem>>, vector<1x256xf32>
    %4 = vector.broadcast %3 : vector<1x256xf32> to vector<128x256xf32>
    %5 = arith.addf %2, %4 : vector<128x256xf32>
    %cst_5 = arith.constant 0.000000e+00 : f32
    %6 = vector.broadcast %cst_5 : f32 to vector<128x256xf32>
    %7 = arith.cmpf ogt, %5, %6 : vector<128x256xf32>
    %cst_6 = arith.constant 1.000000e-01 : f32
    %8 = vector.broadcast %cst_6 : f32 to vector<128x256xf32>
    %9 = arith.mulf %8, %5 : vector<128x256xf32>
    %10 = arith.select %7, %5, %9 : vector<128x256xi1>, vector<128x256xf32>
    %11 = arith.truncf %10 : vector<128x256xf32> to vector<128x256xbf16>
    %c0_7 = arith.constant 0 : index
    %c0_8 = arith.constant 0 : index
    %12 = vector.load %arg4[%c0_7, %c0_8] : memref<256x64xbf16, #tpu.memory_space<vmem>>, vector<256x64xbf16>
    %cst_9 = arith.constant dense<0.000000e+00> : vector<128x64xf32>
    %13 = tpu.matmul %11, %12, %cst_9 {dimension_numbers = #tpu.dot_dimension_numbers<[1], [0], [0], [1], [0, 0, 1, 1], [], []>} : vector<128x256xbf16>, vector<256x64xbf16>, vector<128x64xf32> -> vector<128x64xf32>
    %c0_10 = arith.constant 0 : index
    %c0_11 = arith.constant 0 : index
    %14 = vector.load %arg5[%c0_10, %c0_11] : memref<1x64xf32, #tpu.memory_space<vmem>>, vector<1x64xf32>
    %15 = vector.broadcast %14 : vector<1x64xf32> to vector<128x64xf32>
    %16 = arith.addf %13, %15 : vector<128x64xf32>
    %cst_12 = arith.constant 0.000000e+00 : f32
    %17 = vector.broadcast %cst_12 : f32 to vector<128x64xf32>
    %18 = arith.cmpf ogt, %16, %17 : vector<128x64xf32>
    %cst_13 = arith.constant 1.000000e-01 : f32
    %19 = vector.broadcast %cst_13 : f32 to vector<128x64xf32>
    %20 = arith.mulf %19, %16 : vector<128x64xf32>
    %21 = arith.select %18, %16, %20 : vector<128x64xi1>, vector<128x64xf32>
    %c0_14 = arith.constant 0 : index
    %c0_15 = arith.constant 0 : index
    %22 = vector.load %arg6[%c0_14, %c0_15] : memref<1x64xf32, #tpu.memory_space<vmem>>, vector<1x64xf32>
    %23 = vector.broadcast %22 : vector<1x64xf32> to vector<128x64xf32>
    %24 = arith.mulf %21, %23 : vector<128x64xf32>
    %cst_16 = arith.constant dense<0.000000e+00> : vector<128xf32>
    %25 = vector.multi_reduction <add>, %24, %cst_16 [1] : vector<128x64xf32> to vector<128xf32>
    %c0_17 = arith.constant 0 : index
    %26 = memref.load %arg7[%c0_17] : memref<1xf32, #tpu.memory_space<smem>>
    %27 = vector.broadcast %26 : f32 to vector<128xf32>
    %28 = arith.addf %25, %27 : vector<128xf32>
    %29 = vector.shape_cast %28 : vector<128xf32> to vector<1x128xf32>
    %c0_18 = arith.constant 0 : index
    %c0_19 = arith.constant 0 : index
    %30 = vector.load %arg8[%c0_18, %c0_19] : memref<1x128xf32, #tpu.memory_space<vmem>>, vector<1x128xf32>
    tpu.vector_store %arg8[%c0_18, %c0_19], %29 {strides = array<i32>} : memref<1x128xf32, #tpu.memory_space<vmem>>, vector<1x128xf32>,
    return
  }
  func.func @transform_0(%arg0: i32) -> (i32, i32) {
    %c0_i32 = arith.constant 0 : i32
    %c0_i32_0 = arith.constant 0 : i32
    return %arg0, %c0_i32 : i32, i32
  }
  func.func @transform_1(%arg0: i32) -> (i32, i32) {
    %c0_i32 = arith.constant 0 : i32
    %c0_i32_0 = arith.constant 0 : i32
    %c0_i32_1 = arith.constant 0 : i32
    return %c0_i32, %c0_i32_0 : i32, i32
  }
  func.func @transform_2(%arg0: i32) -> (i32, i32) {
    %c0_i32 = arith.constant 0 : i32
    %c0_i32_0 = arith.constant 0 : i32
    %c0_i32_1 = arith.constant 0 : i32
    return %c0_i32, %c0_i32_0 : i32, i32
  }
  func.func @transform_3(%arg0: i32) -> (i32, i32) {
    %c0_i32 = arith.constant 0 : i32
    %c0_i32_0 = arith.constant 0 : i32
    %c0_i32_1 = arith.constant 0 : i32
    return %c0_i32, %c0_i32_0 : i32, i32
  }
  func.func @transform_4(%arg0: i32) -> (i32, i32) {
    %c0_i32 = arith.constant 0 : i32
    %c0_i32_0 = arith.constant 0 : i32
    %c0_i32_1 = arith.constant 0 : i32
    return %c0_i32, %c0_i32_0 : i32, i32
  }
  func.func @transform_5(%arg0: i32) -> (i32, i32) {
    %c0_i32 = arith.constant 0 : i32
    %c0_i32_0 = arith.constant 0 : i32
    %c0_i32_1 = arith.constant 0 : i32
    return %c0_i32, %c0_i32_0 : i32, i32
  }
  func.func @transform_6(%arg0: i32) -> i32 {
    %c0_i32 = arith.constant 0 : i32
    %c0_i32_0 = arith.constant 0 : i32
    return %c0_i32 : i32
  }
  func.func @transform_7(%arg0: i32) -> (i32, i32) {
    %c0_i32 = arith.constant 0 : i32
    %c0_i32_0 = arith.constant 0 : i32
    return %c0_i32, %arg0 : i32, i32
  }
}

</mosaic_0001>

<bundles_post_ra>
// kernel: tpu_custom_call.1
= control target key start
LH: loop header
LB: loop body
LE: loop exit
PB: predicated region body
PF: predicated region fallthrough
CT: control target
= control target key end

     0   :  { %v1119_v2 = vmov 0   ;;  %s1463_s0 = inlined_call_operand.vmem [shape: bf16[128,128], index: 0, kind: input, shape index: {}]   ;;  %s1464_s1 = inlined_call_operand.vmem [shape: bf16[128,256], index: 1, kind: input, shape index: {}]   ;;  %s1465_s2 = inlined_call_operand.vmem [shape: f32[1,256], index: 2, kind: input, shape index: {}]   ;;  %s1466_s3 = inlined_call_operand.vmem [shape: bf16[256,64], index: 3, kind: input, shape index: {}]   ;;  %s1467_s4 = inlined_call_operand.vmem [shape: f32[1,64], index: 4, kind: input, shape index: {}]   ;;  %s1468_s5 = inlined_call_operand.vmem [shape: f32[1,64], index: 5, kind: input, shape index: {}]   ;;  %s1469_s6 = inlined_call_operand.<no memory space> [shape: f32[1], index: 6, kind: input, shape index: {}]   ;;  %s1470_s7 = inlined_call_operand.hbm [shape: f32[1,128], index: 7, kind: output, shape index: {}]  }
   0x1   :  { %v1047_v0 = vld [vmem:[%s1464_s1 + $0x4] ss:$8 sps:$4 sm:$0xff]   ;;  %v1049_v1 = vld [vmem:[%s1464_s1] ss:$8 sps:$4 sm:$0xff]   ;;  %233 = vmatprep.mubr.bf16.mxu0 %v1119_v2  ;;  %v1050_v3 = vld [vmem:[%s1464_s1 + $0x14] ss:$8 sps:$4 sm:$0xff]  }
   0x2   :  { %201 = vmatprep.subr.bf16.mxu0 %v1047_v0  ;;  %v1052_v4 = vld [vmem:[%s1464_s1 + $0x10] ss:$8 sps:$4 sm:$0xff]   ;;  %v1053_v5 = vld [vmem:[%s1464_s1 + $0x24] ss:$8 sps:$4 sm:$0xff]   ;;  %v1055_v6 = vld [vmem:[%s1464_s1 + $0x20] ss:$8 sps:$4 sm:$0xff]  }
   0x3   :  { %202 = vmatpush1.bf16.msra.mxu0 %v1049_v1  ;;  %v1056_v7 = vld [vmem:[%s1464_s1 + $0x34] ss:$8 sps:$4 sm:$0xff]   ;;  %v1058_v8 = vld [vmem:[%s1464_s1 + $0x30] ss:$8 sps:$4 sm:$0xff]   ;;  %v1059_v9 = vld [vmem:[%s1464_s1 + $0x44] ss:$8 sps:$4 sm:$0xff]  }
   0x4   :  { %203 = vmatprep.subr.bf16.mxu0 %v1050_v3  ;;  %v1061_v10 = vld [vmem:[%s1464_s1 + $0x40] ss:$8 sps:$4 sm:$0xff]   ;;  %v1062_v11 = vld [vmem:[%s1464_s1 + $0x54] ss:$8 sps:$4 sm:$0xff]   ;;  %v1064_v12 = vld [vmem:[%s1464_s1 + $0x50] ss:$8 sps:$4 sm:$0xff]  }
   0x5   :  { %v1065_v13 = vld [vmem:[%s1464_s1 + $0x64] ss:$8 sps:$4 sm:$0xff]   ;;  %v1067_v16 = vld [vmem:[%s1464_s1 + $0x60] ss:$8 sps:$4 sm:$0xff]   ;;  %v1083_v19 = vld [vmem:[%s1466_s3 + $0x50] sm:$0xff]  }
   0x6   :  { %v1079_v14 = vld [vmem:[%s1466_s3 + $0x40] sm:$0xff]   ;;  %v1081_v17 = vld [vmem:[%s1466_s3 + $0x48] sm:$0xff]   ;;  %v1068_v20 = vld [vmem:[%s1464_s1 + $0x74] ss:$8 sps:$4 sm:$0xff]  }
   0x7   :  { %204 = vmatpush1.bf16.msra.mxu0 %v1052_v4  ;;  %v1080_v15 = vld [vmem:[%s1466_s3] sm:$0xff]   ;;  %981 = vmatprep.subr.bf16.mxu1 %v1079_v14  ;;  %v1082_v18 = vld [vmem:[%s1466_s3 + $0x8] sm:$0xff]   ;;  %v1070_v21 = vld [vmem:[%s1464_s1 + $0x70] ss:$8 sps:$4 sm:$0xff]  }
   0x8   :  { %205 = vmatprep.subr.bf16.mxu0 %v1053_v5  ;;  %982 = vmatpush3.bf16.msra.mxu1 %v1080_v15  ;;  %v1084_v22 = vld [vmem:[%s1466_s3 + $0x10] sm:$0xff]   ;;  %v1085_v23 = vld [vmem:[%s1466_s3 + $0x58] sm:$0xff]   ;;  %v1071_v24 = vld [vmem:[%s1463_s0] sm:$0xff]  }
   0x9   :  { %983 = vmatprep.subr.bf16.mxu1 %v1081_v17  ;;  %v1086_v25 = vld [vmem:[%s1466_s3 + $0x18] sm:$0xff]   ;;  %v1087_v26 = vld [vmem:[%s1466_s3 + $0x60] sm:$0xff]  }
   0xb   :  { %206 = vmatpush1.bf16.msra.mxu0 %v1055_v6 }
   0xc   :  { %207 = vmatprep.subr.bf16.mxu0 %v1056_v7  ;;  %984 = vmatpush3.bf16.msra.mxu1 %v1082_v18 }
   0xd   :  { %985 = vmatprep.subr.bf16.mxu1 %v1083_v19 }
   0xf   :  { %208 = vmatpush1.bf16.msra.mxu0 %v1058_v8 }
  0x10   :  { %209 = vmatprep.subr.bf16.mxu0 %v1059_v9  ;;  %986 = vmatpush3.bf16.msra.mxu1 %v1084_v22 }
  0x11   :  { %987 = vmatprep.subr.bf16.mxu1 %v1085_v23 }
  0x13   :  { %210 = vmatpush1.bf16.msra.mxu0 %v1061_v10 }
  0x14   :  { %211 = vmatprep.subr.bf16.mxu0 %v1062_v11 }
  0x17   :  { %212 = vmatpush1.bf16.msra.mxu0 %v1064_v12 }
  0x18   :  { %213 = vmatprep.subr.bf16.mxu0 %v1065_v13 }
  0x1b   :  { %214 = vmatpush1.bf16.msra.mxu0 %v1067_v16 }
  0x1c   :  { %215 = vmatprep.subr.bf16.mxu0 %v1068_v20 }
  0x1f   :  { %216 = vmatpush1.bf16.msra.mxu0 %v1070_v21 }
  0x20   :  { %13 = vsyncpa [#allocation4], 0  ;;  %988 = vmatpush3.bf16.msra.mxu1 %v1086_v25  ;;  %v1088_v27 = vld [vmem:[%s1466_s3 + $0x20] sm:$0xff]   ;;  %v1072_v28 = vld [vmem:[%s1463_s0 + $0x8] sm:$0xff]   ;;  %v63_v41 = vlaneseq }
  0x21   :  { %989 = vmatprep.subr.bf16.mxu1 %v1087_v26  ;;  %v1073_v29 = vld [vmem:[%s1463_s0 + $0x10] sm:$0xff]   ;;  %v1074_v30 = vld [vmem:[%s1463_s0 + $0x18] sm:$0xff]   ;;  %v1075_v31 = vld [vmem:[%s1463_s0 + $0x20] sm:$0xff]  }
  0x22   :  { %234 = vmatmul.mubr.bf16.vlgmr.msra.gmra.mrb[0].mxu0 %v1071_v24  ;;  %v1076_v32 = vld [vmem:[%s1463_s0 + $0x28] sm:$0xff]   ;;  %v1077_v33 = vld [vmem:[%s1463_s0 + $0x30] sm:$0xff]   ;;  %v1078_v34 = vld [vmem:[%s1463_s0 + $0x38] sm:$0xff]   ;;  %v1290_v42 = vshrl.u32 %v63_v41, 7 }
  0x23   :  { %243 = vmatprep.mubr.bf16.mxu0 %v1119_v2  ;;  %v1089_v35 = vld [vmem:[%s1466_s3 + $0x68] sm:$0xff]   ;;  %v1091_v37 = vld [vmem:[%s1466_s3 + $0x70] sm:$0xff]   ;;  %v1093_v39 = vld [vmem:[%s1466_s3 + $0x78] sm:$0xff]  }
  0x24   :  { %990 = vmatpush3.bf16.msra.mxu1 %v1088_v27  ;;  %v1090_v36 = vld [vmem:[%s1466_s3 + $0x28] sm:$0xff]   ;;  %v1092_v38 = vld [vmem:[%s1466_s3 + $0x30] sm:$0xff]   ;;  %v1094_v40 = vld [vmem:[%s1466_s3 + $0x38] sm:$0xff]   ;;  %v65_v43 = vsub.s32 0, %v1290_v42  ;;  %v69_v45 = vsub.s32 1, %v1290_v42 }
  0x25   :  { %991 = vmatprep.subr.bf16.mxu1 %v1089_v35  ;;  %v61_v44 = vld [vmem:[%s1465_s2] sm:$0x3] }
  0x26   :  { %v1297_v46 = vrot.slane %v61_v44, %v65_v43  ;;  %v1299_v47 = vrot.slane %v61_v44, %v69_v45 }
  0x28   :  { %992 = vmatpush3.bf16.msra.mxu1 %v1090_v36 }
  0x29   :  { %993 = vmatprep.subr.bf16.mxu1 %v1091_v37 }
  0x2a   :  { %244 = vmatmul.mubr.bf16.gmra.mrb[4].mxu0 %v1072_v28 }
  0x2b   :  { %253 = vmatprep.mubr.bf16.mxu0 %v1119_v2 }
  0x2c   :  { %994 = vmatpush3.bf16.msra.mxu1 %v1092_v38 }
  0x2d   :  { %995 = vmatprep.subr.bf16.mxu1 %v1093_v39 }
  0x30   :  { %996 = vmatpush3.bf16.msra.mxu1 %v1094_v40 }
  0x32   :  { %254 = vmatmul.mubr.bf16.gmra.mrb[8].mxu0 %v1073_v29 }
  0x33   :  { %263 = vmatprep.mubr.bf16.mxu0 %v1119_v2 }
  0x3a   :  { %264 = vmatmul.mubr.bf16.gmra.mrb[12].mxu0 %v1074_v30 }
  0x3b   :  { %273 = vmatprep.mubr.bf16.mxu0 %v1119_v2 }
  0x42   :  { %274 = vmatmul.mubr.bf16.gmra.mrb[16].mxu0 %v1075_v31 }
  0x43   :  { %283 = vmatprep.mubr.bf16.mxu0 %v1119_v2 }
  0x4a   :  { %284 = vmatmul.mubr.bf16.gmra.mrb[20].mxu0 %v1076_v32 }
  0x4b   :  { %293 = vmatprep.mubr.bf16.mxu0 %v1119_v2 }
  0x52   :  { %294 = vmatmul.mubr.bf16.gmra.mrb[24].mxu0 %v1077_v33 }
  0x53   :  { %303 = vmatprep.mubr.bf16.mxu0 %v1119_v2 }
  0x5a   :  { %304 = vmatmul.mubr.bf16.gmra.mrb[28].mxu0 %v1078_v34 }
  0xf5   :  { %v235_v48 = vpop.f32.mrb[0].mxu0 }
  0xf6   :  { %v236_v49 = vadd.f32 %v235_v48, %v1297_v46  ;;  %v237_v50 = vpop.f32.mrb[1].mxu0 }
  0xf7   :  { %v238_v51 = vadd.f32 %v237_v50, %v1299_v47  ;;  %v239_v52 = vpop.f32.mrb[2].mxu0 }
  0xf8   :  { %v346_v53 = vmul.f32 0.1, %v236_v49  ;;  %v240_v54 = vadd.f32 %v239_v52, %v1297_v46  ;;  %v241_v55 = vpop.f32.mrb[3].mxu0  ;;  %vm314_vm0 = vcmp.gt.f32.partialorder %v236_v49, 0.0 }
  0xf9   :  { %v347_v56 = vmul.f32 0.1, %v238_v51  ;;  %v242_v57 = vadd.f32 %v241_v55, %v1299_v47  ;;  %vm315_vm2 = vcmp.gt.f32.partialorder %v238_v51, 0.0 }
  0xfa   :  { %vm316_vm1 = vcmp.gt.f32.partialorder %v240_v54, 0.0  ;;  %v348_v58 = vmul.f32 0.1, %v240_v54  ;;  %v378_v60 = vsel %vm314_vm0, %v236_v49, %v346_v53 }
  0xfb   :  { %v349_v59 = vmul.f32 0.1, %v242_v57  ;;  %vm317_vm3 = vcmp.gt.f32.partialorder %v242_v57, 0.0  ;;  %v379_v63 = vsel %vm315_vm2, %v238_v51, %v347_v56 }
  0xfc   :  { %v380_v61 = vsel %vm316_vm1, %v240_v54, %v348_v58 }
  0xfd   :  { %v245_v62 = vpop.f32.mrb[4].mxu0  ;;  %v381_v0 = vsel %vm317_vm3, %v242_v57, %v349_v59  ;;  %v410_v1 = vpack.c.bf16 %v380_v61, %v378_v60 }
  0xfe   :  { %v246_v2 = vadd.f32 %v245_v62, %v1297_v46  ;;  %v247_v3 = vpop.f32.mrb[5].mxu0  ;;  %v411_v4 = vpack.c.bf16 %v381_v0, %v379_v63 }
  0xff   :  { %v248_v5 = vadd.f32 %v247_v3, %v1299_v47  ;;  %v249_v6 = vpop.f32.mrb[6].mxu0 }
 0x100   :  { %v350_v7 = vmul.f32 0.1, %v246_v2  ;;  %v250_v8 = vadd.f32 %v249_v6, %v1297_v46  ;;  %v251_v9 = vpop.f32.mrb[7].mxu0  ;;  %593 = vmatprep.mubr.bf16.mxu1 %v411_v4  ;;  %vm318_vm4 = vcmp.gt.f32.partialorder %v246_v2, 0.0 }
 0x101   :  { %v351_v10 = vmul.f32 0.1, %v248_v5  ;;  %v252_v11 = vadd.f32 %v251_v9, %v1299_v47  ;;  %594 = vmatmul.mubr.bf16.vlgmr.msra.gmra.mrb[0].mxu1 %v410_v1  ;;  %vm319_vm5 = vcmp.gt.f32.partialorder %v248_v5, 0.0 }
 0x102   :  { %vm320_vm6 = vcmp.gt.f32.partialorder %v250_v8, 0.0  ;;  %v352_v12 = vmul.f32 0.1, %v250_v8  ;;  %v382_v14 = vsel %vm318_vm4, %v246_v2, %v350_v7 }
 0x103   :  { %vm321_vm7 = vcmp.gt.f32.partialorder %v252_v11, 0.0  ;;  %v353_v13 = vmul.f32 0.1, %v252_v11  ;;  %v383_v17 = vsel %vm319_vm5, %v248_v5, %v351_v10 }
 0x104   :  { %v384_v15 = vsel %vm320_vm6, %v250_v8, %v352_v12 }
 0x105   :  { %v255_v16 = vpop.f32.mrb[8].mxu0  ;;  %v385_v18 = vsel %vm321_vm7, %v252_v11, %v353_v13  ;;  %v412_v19 = vpack.c.bf16 %v384_v15, %v382_v14 }
 0x106   :  { %v256_v20 = vadd.f32 %v255_v16, %v1297_v46  ;;  %v257_v21 = vpop.f32.mrb[9].mxu0  ;;  %v413_v22 = vpack.c.bf16 %v385_v18, %v383_v17 }
 0x107   :  { %v258_v23 = vadd.f32 %v257_v21, %v1299_v47  ;;  %v259_v24 = vpop.f32.mrb[10].mxu0 }
 0x108   :  { %v354_v25 = vmul.f32 0.1, %v256_v20  ;;  %v260_v26 = vadd.f32 %v259_v24, %v1297_v46  ;;  %v261_v27 = vpop.f32.mrb[11].mxu0  ;;  %601 = vmatprep.mubr.bf16.mxu1 %v413_v22  ;;  %vm322_vm8 = vcmp.gt.f32.partialorder %v256_v20, 0.0 }
 0x109   :  { %v355_v28 = vmul.f32 0.1, %v258_v23  ;;  %v262_v29 = vadd.f32 %v261_v27, %v1299_v47  ;;  %602 = vmatmul.mubr.bf16.gmra.mrb[4].mxu1 %v412_v19  ;;  %vm323_vm9 = vcmp.gt.f32.partialorder %v258_v23, 0.0 }
 0x10a   :  { %vm324_vm10 = vcmp.gt.f32.partialorder %v260_v26, 0.0  ;;  %v356_v30 = vmul.f32 0.1, %v260_v26  ;;  %v386_v32 = vsel %vm322_vm8, %v256_v20, %v354_v25 }
 0x10b   :  { %vm325_vm11 = vcmp.gt.f32.partialorder %v262_v29, 0.0  ;;  %v357_v31 = vmul.f32 0.1, %v262_v29  ;;  %v387_v35 = vsel %vm323_vm9, %v258_v23, %v355_v28 }
 0x10c   :  { %v388_v33 = vsel %vm324_vm10, %v260_v26, %v356_v30 }
 0x10d   :  { %v265_v34 = vpop.f32.mrb[12].mxu0  ;;  %v389_v36 = vsel %vm325_vm11, %v262_v29, %v357_v31  ;;  %v414_v37 = vpack.c.bf16 %v388_v33, %v386_v32 }
 0x10e   :  { %v266_v38 = vadd.f32 %v265_v34, %v1297_v46  ;;  %v267_v39 = vpop.f32.mrb[13].mxu0  ;;  %v415_v40 = vpack.c.bf16 %v389_v36, %v387_v35 }
 0x10f   :  { %v268_v43 = vadd.f32 %v267_v39, %v1299_v47  ;;  %v269_v44 = vpop.f32.mrb[14].mxu0 }
 0x110   :  { %v358_v45 = vmul.f32 0.1, %v266_v38  ;;  %v270_v48 = vadd.f32 %v269_v44, %v1297_v46  ;;  %v271_v49 = vpop.f32.mrb[15].mxu0  ;;  %609 = vmatprep.mubr.bf16.mxu1 %v415_v40  ;;  %vm326_vm12 = vcmp.gt.f32.partialorder %v266_v38, 0.0 }
 0x111   :  { %v359_v50 = vmul.f32 0.1, %v268_v43  ;;  %v272_v51 = vadd.f32 %v271_v49, %v1299_v47  ;;  %610 = vmatmul.mubr.bf16.gmra.mrb[8].mxu1 %v414_v37  ;;  %vm327_vm13 = vcmp.gt.f32.partialorder %v268_v43, 0.0 }
 0x112   :  { %vm328_vm14 = vcmp.gt.f32.partialorder %v270_v48, 0.0  ;;  %v360_v52 = vmul.f32 0.1, %v270_v48  ;;  %v390_v54 = vsel %vm326_vm12, %v266_v38, %v358_v45 }
 0x113   :  { %vm329_vm15 = vcmp.gt.f32.partialorder %v272_v51, 0.0  ;;  %v361_v53 = vmul.f32 0.1, %v272_v51  ;;  %v391_v57 = vsel %vm327_vm13, %v268_v43, %v359_v50 }
 0x114   :  { %v392_v55 = vsel %vm328_vm14, %v270_v48, %v360_v52 }
 0x115   :  { %v275_v56 = vpop.f32.mrb[16].mxu0  ;;  %v393_v58 = vsel %vm329_vm15, %v272_v51, %v361_v53  ;;  %v416_v59 = vpack.c.bf16 %v392_v55, %v390_v54 }
 0x116   :  { %v276_v60 = vadd.f32 %v275_v56, %v1297_v46  ;;  %v277_v61 = vpop.f32.mrb[17].mxu0  ;;  %v417_v62 = vpack.c.bf16 %v393_v58, %v391_v57 }
 0x117   :  { %v278_v63 = vadd.f32 %v277_v61, %v1299_v47  ;;  %v279_v0 = vpop.f32.mrb[18].mxu0 }
 0x118   :  { %v362_v1 = vmul.f32 0.1, %v276_v60  ;;  %v280_v2 = vadd.f32 %v279_v0, %v1297_v46  ;;  %v281_v3 = vpop.f32.mrb[19].mxu0  ;;  %617 = vmatprep.mubr.bf16.mxu1 %v417_v62  ;;  %vm330_vm0 = vcmp.gt.f32.partialorder %v276_v60, 0.0 }
 0x119   :  { %v363_v4 = vmul.f32 0.1, %v278_v63  ;;  %v282_v5 = vadd.f32 %v281_v3, %v1299_v47  ;;  %618 = vmatmul.mubr.bf16.gmra.mrb[12].mxu1 %v416_v59  ;;  %vm331_vm1 = vcmp.gt.f32.partialorder %v278_v63, 0.0 }
 0x11a   :  { %vm332_vm2 = vcmp.gt.f32.partialorder %v280_v2, 0.0  ;;  %v364_v6 = vmul.f32 0.1, %v280_v2  ;;  %v394_v8 = vsel %vm330_vm0, %v276_v60, %v362_v1 }
 0x11b   :  { %vm333_vm3 = vcmp.gt.f32.partialorder %v282_v5, 0.0  ;;  %v365_v7 = vmul.f32 0.1, %v282_v5  ;;  %v395_v11 = vsel %vm331_vm1, %v278_v63, %v363_v4  ;;  %vm729_vm1 = vcmask 523264  }
 0x11c   :  { %v396_v9 = vsel %vm332_vm2, %v280_v2, %v364_v6 }
 0x11d   :  { %v285_v10 = vpop.f32.mrb[20].mxu0  ;;  %v397_v12 = vsel %vm333_vm3, %v282_v5, %v365_v7  ;;  %v418_v13 = vpack.c.bf16 %v396_v9, %v394_v8  ;;  %v1336_v8 = vld [vmem:[%s1467_s4] ss:$0 sm:$0xff] }
 0x11e   :  { %v286_v14 = vadd.f32 %v285_v10, %v1297_v46  ;;  %v287_v15 = vpop.f32.mrb[21].mxu0  ;;  %v419_v16 = vpack.c.bf16 %v397_v12, %v395_v11 }
 0x11f   :  { %v288_v17 = vadd.f32 %v287_v15, %v1299_v47  ;;  %v289_v18 = vpop.f32.mrb[22].mxu0 }
 0x120   :  { %v366_v19 = vmul.f32 0.1, %v286_v14  ;;  %v290_v20 = vadd.f32 %v289_v18, %v1297_v46  ;;  %v291_v21 = vpop.f32.mrb[23].mxu0  ;;  %625 = vmatprep.mubr.bf16.mxu1 %v419_v16  ;;  %vm334_vm4 = vcmp.gt.f32.partialorder %v286_v14, 0.0  ;;  %v1343_v16 = vld [vmem:[%s1468_s5] ss:$0 sm:$0xff] }
 0x121   :  { %v367_v22 = vmul.f32 0.1, %v288_v17  ;;  %v292_v23 = vadd.f32 %v291_v21, %v1299_v47  ;;  %626 = vmatmul.mubr.bf16.gmra.mrb[16].mxu1 %v418_v13  ;;  %vm335_vm5 = vcmp.gt.f32.partialorder %v288_v17, 0.0 }
 0x122   :  { %vm336_vm6 = vcmp.gt.f32.partialorder %v290_v20, 0.0  ;;  %v368_v24 = vmul.f32 0.1, %v290_v20  ;;  %v398_v26 = vsel %vm334_vm4, %v286_v14, %v366_v19 }
 0x123   :  { %vm337_vm7 = vcmp.gt.f32.partialorder %v292_v23, 0.0  ;;  %v369_v25 = vmul.f32 0.1, %v292_v23  ;;  %v399_v29 = vsel %vm335_vm5, %v288_v17, %v367_v22 }
 0x124   :  { %v400_v27 = vsel %vm336_vm6, %v290_v20, %v368_v24 }
 0x125   :  { %v295_v28 = vpop.f32.mrb[24].mxu0  ;;  %v401_v30 = vsel %vm337_vm7, %v292_v23, %v369_v25  ;;  %v420_v31 = vpack.c.bf16 %v400_v27, %v398_v26 }
 0x126   :  { %v296_v32 = vadd.f32 %v295_v28, %v1297_v46  ;;  %v297_v33 = vpop.f32.mrb[25].mxu0  ;;  %v421_v34 = vpack.c.bf16 %v401_v30, %v399_v29 }
 0x127   :  { %v298_v35 = vadd.f32 %v297_v33, %v1299_v47  ;;  %v299_v36 = vpop.f32.mrb[26].mxu0 }
 0x128   :  { %v370_v37 = vmul.f32 0.1, %v296_v32  ;;  %v300_v38 = vadd.f32 %v299_v36, %v1297_v46  ;;  %v301_v39 = vpop.f32.mrb[27].mxu0  ;;  %633 = vmatprep.mubr.bf16.mxu1 %v421_v34  ;;  %vm338_vm8 = vcmp.gt.f32.partialorder %v296_v32, 0.0 }
 0x129   :  { %v371_v40 = vmul.f32 0.1, %v298_v35  ;;  %v302_v43 = vadd.f32 %v301_v39, %v1299_v47  ;;  %634 = vmatmul.mubr.bf16.gmra.mrb[20].mxu1 %v420_v31  ;;  %vm339_vm9 = vcmp.gt.f32.partialorder %v298_v35, 0.0 }
 0x12a   :  { %vm340_vm10 = vcmp.gt.f32.partialorder %v300_v38, 0.0  ;;  %v372_v44 = vmul.f32 0.1, %v300_v38  ;;  %v402_v48 = vsel %vm338_vm8, %v296_v32, %v370_v37 }
 0x12b   :  { %vm341_vm11 = vcmp.gt.f32.partialorder %v302_v43, 0.0  ;;  %v373_v45 = vmul.f32 0.1, %v302_v43  ;;  %v403_v51 = vsel %vm339_vm9, %v298_v35, %v371_v40 }
 0x12c   :  { %v404_v49 = vsel %vm340_vm10, %v300_v38, %v372_v44 }
 0x12d   :  { %v305_v50 = vpop.f32.mrb[28].mxu0  ;;  %v405_v52 = vsel %vm341_vm11, %v302_v43, %v373_v45  ;;  %v422_v53 = vpack.c.bf16 %v404_v49, %v402_v48 }
 0x12e   :  { %v306_v54 = vadd.f32 %v305_v50, %v1297_v46  ;;  %v307_v55 = vpop.f32.mrb[29].mxu0  ;;  %v423_v56 = vpack.c.bf16 %v405_v52, %v403_v51 }
 0x12f   :  { %v308_v57 = vadd.f32 %v307_v55, %v1299_v47  ;;  %v309_v58 = vpop.f32.mrb[30].mxu0 }
 0x130   :  { %v374_v59 = vmul.f32 0.1, %v306_v54  ;;  %v310_v60 = vadd.f32 %v309_v58, %v1297_v46  ;;  %v311_v61 = vpop.f32.mrb[31].mxu0  ;;  %641 = vmatprep.mubr.bf16.mxu1 %v423_v56  ;;  %vm342_vm12 = vcmp.gt.f32.partialorder %v306_v54, 0.0 }
 0x131   :  { %v375_v62 = vmul.f32 0.1, %v308_v57  ;;  %v312_v63 = vadd.f32 %v311_v61, %v1299_v47  ;;  %642 = vmatmul.mubr.bf16.gmra.mrb[24].mxu1 %v422_v53  ;;  %vm343_vm13 = vcmp.gt.f32.partialorder %v308_v57, 0.0 }
 0x132   :  { %vm344_vm14 = vcmp.gt.f32.partialorder %v310_v60, 0.0  ;;  %v376_v0 = vmul.f32 0.1, %v310_v60  ;;  %v406_v2 = vsel %vm342_vm12, %v306_v54, %v374_v59 }
 0x133   :  { %vm345_vm15 = vcmp.gt.f32.partialorder %v312_v63, 0.0  ;;  %v377_v1 = vmul.f32 0.1, %v312_v63  ;;  %v407_v4 = vsel %vm343_vm13, %v308_v57, %v375_v62 }
 0x134   :  { %v408_v3 = vsel %vm344_vm14, %v310_v60, %v376_v0 }
 0x135   :  { %v409_v5 = vsel %vm345_vm15, %v312_v63, %v377_v1  ;;  %v424_v6 = vpack.c.bf16 %v408_v3, %v406_v2 }
 0x136   :  { %v425_v7 = vpack.c.bf16 %v409_v5, %v407_v4 }
 0x138   :  { %649 = vmatprep.mubr.bf16.mxu1 %v425_v7 }
 0x139   :  { %650 = vmatmul.mubr.bf16.gmra.mrb[28].mxu1 %v424_v6 }
 0x1d4   :  { %v997_v46 = vpop.f32.mrb[0].mxu1 }
 0x1d5   :  { %v998_v47 = vpop.f32.mrb[1].mxu1 }
 0x1d6   :  { %v999_v9 = vadd.f32 %v998_v47, %v997_v46  ;;  %v1000_v10 = vpop.f32.mrb[2].mxu1 }
 0x1d7   :  { %v1001_v11 = vpop.f32.mrb[3].mxu1 }
 0x1d8   :  { %v596_v12 = vadd.f32 %v999_v9, %v1336_v8  ;;  %v1002_v13 = vadd.f32 %v1001_v11, %v1000_v10 }
 0x1da   :  { %v674_v14 = vmul.f32 0.1, %v596_v12  ;;  %v599_v15 = vadd.f32 %v1002_v13, %v1336_v8  ;;  %vm658_vm0 = vcmp.gt.f32.partialorder %v596_v12, 0.0 }
 0x1dc   :  { %v675_v17 = vmul.f32 0.1, %v599_v15  ;;  %v1003_v18 = vpop.f32.mrb[4].mxu1  ;;  %v690_v19 = vsel %vm658_vm0, %v596_v12, %v674_v14  ;;  %vm659_vm2 = vcmp.gt.f32.partialorder %v599_v15, 0.0 }
 0x1dd   :  { %v1004_v20 = vpop.f32.mrb[5].mxu1  ;;  %v713_v21 = vmul.f32 %v1343_v16, %v690_v19 }
 0x1de   :  { %v1005_v22 = vadd.f32 %v1004_v20, %v1003_v18  ;;  %v1006_v23 = vpop.f32.mrb[6].mxu1  ;;  %v691_v24 = vsel %vm659_vm2, %v599_v15, %v675_v17  ;;  %vm830_vm2 = vcmask 195712  }
 0x1df   :  { %v1007_v25 = vpop.f32.mrb[7].mxu1  ;;  %v730_v26 = vsel %vm729_vm1, %v713_v21, 0.0  ;;  %v714_v27 = vmul.f32 %v1343_v16, %v691_v24 }
 0x1e0   :  { %v604_v28 = vadd.f32 %v1005_v22, %v1336_v8  ;;  %v1008_v29 = vadd.f32 %v1007_v25, %v1006_v23  ;;  %731 = vadd.xlane.f32.xlu0 %v730_v26 }
 0x1e1   :  { %v733_v32 = vsel %vm729_vm1, %v714_v27, 0.0 }
 0x1e2   :  { %v676_v30 = vmul.f32 0.1, %v604_v28  ;;  %v607_v31 = vadd.f32 %v1008_v29, %v1336_v8  ;;  %vm660_vm3 = vcmp.gt.f32.partialorder %v604_v28, 0.0 }
 0x1e4   :  { %v677_v33 = vmul.f32 0.1, %v607_v31  ;;  %v1009_v34 = vpop.f32.mrb[8].mxu1  ;;  %734 = vadd.xlane.f32.xlu0 %v733_v32  ;;  %v692_v35 = vsel %vm660_vm3, %v604_v28, %v676_v30  ;;  %vm661_vm4 = vcmp.gt.f32.partialorder %v607_v31, 0.0  ;;  %vm837_vm3 = vcmask 261312  }
 0x1e5   :  { %v1010_v36 = vpop.f32.mrb[9].mxu1  ;;  %v715_v37 = vmul.f32 %v1343_v16, %v692_v35 }
 0x1e6   :  { %v1011_v38 = vadd.f32 %v1010_v36, %v1009_v34  ;;  %v1012_v39 = vpop.f32.mrb[10].mxu1  ;;  %v693_v40 = vsel %vm661_vm4, %v607_v31, %v677_v33  ;;  %vm844_vm4 = vcmask 326912  }
 0x1e7   :  { %v1013_v43 = vpop.f32.mrb[11].mxu1  ;;  %v736_v44 = vsel %vm729_vm1, %v715_v37, 0.0  ;;  %v716_v45 = vmul.f32 %v1343_v16, %v693_v40 }
 0x1e8   :  { %v612_v48 = vadd.f32 %v1011_v38, %v1336_v8  ;;  %v1014_v49 = vadd.f32 %v1013_v43, %v1012_v39  ;;  %737 = vadd.xlane.f32.xlu1 %v736_v44 }
 0x1e9   :  { %v739_v52 = vsel %vm729_vm1, %v716_v45, 0.0 }
 0x1ea   :  { %v678_v50 = vmul.f32 0.1, %v612_v48  ;;  %v615_v51 = vadd.f32 %v1014_v49, %v1336_v8  ;;  %vm662_vm5 = vcmp.gt.f32.partialorder %v612_v48, 0.0 }
 0x1ec   :  { %v679_v53 = vmul.f32 0.1, %v615_v51  ;;  %v1015_v54 = vpop.f32.mrb[12].mxu1  ;;  %740 = vadd.xlane.f32.xlu1 %v739_v52  ;;  %v694_v55 = vsel %vm662_vm5, %v612_v48, %v678_v50  ;;  %vm663_vm6 = vcmp.gt.f32.partialorder %v615_v51, 0.0  ;;  %vm851_vm5 = vcmask 392512  }
 0x1ed   :  { %v1016_v56 = vpop.f32.mrb[13].mxu1  ;;  %v717_v57 = vmul.f32 %v1343_v16, %v694_v55 }
 0x1ee   :  { %v1017_v58 = vadd.f32 %v1016_v56, %v1015_v54  ;;  %v1018_v59 = vpop.f32.mrb[14].mxu1  ;;  %v695_v60 = vsel %vm663_vm6, %v615_v51, %v679_v53  ;;  %vm858_vm6 = vcmask 458112  }
 0x1ef   :  { %v1019_v61 = vpop.f32.mrb[15].mxu1  ;;  %v742_v62 = vsel %vm729_vm1, %v717_v57, 0.0  ;;  %v718_v63 = vmul.f32 %v1343_v16, %v695_v60 }
 0x1f0   :  { %v620_v0 = vadd.f32 %v1017_v58, %v1336_v8  ;;  %v1020_v1 = vadd.f32 %v1019_v61, %v1018_v59  ;;  %743 = vadd.xlane.f32.xlu0 %v742_v62 }
 0x1f1   :  { %v745_v2 = vsel %vm729_vm1, %v718_v63, 0.0 }
 0x1f2   :  { %v680_v3 = vmul.f32 0.1, %v620_v0  ;;  %v623_v4 = vadd.f32 %v1020_v1, %v1336_v8  ;;  %746 = vadd.xlane.f32.xlu1 %v745_v2  ;;  %vm664_vm7 = vcmp.gt.f32.partialorder %v620_v0, 0.0 }
 0x1f4   :  { %v681_v5 = vmul.f32 0.1, %v623_v4  ;;  %v1021_v6 = vpop.f32.mrb[16].mxu1  ;;  %v696_v7 = vsel %vm664_vm7, %v620_v0, %v680_v3  ;;  %vm665_vm8 = vcmp.gt.f32.partialorder %v623_v4, 0.0  ;;  %vm865_vm7 = vcmask 523712  }
 0x1f5   :  { %v1022_v46 = vpop.f32.mrb[17].mxu1  ;;  %v719_v47 = vmul.f32 %v1343_v16, %v696_v7 }
 0x1f6   :  { %v1023_v9 = vadd.f32 %v1022_v46, %v1021_v6  ;;  %v1024_v10 = vpop.f32.mrb[18].mxu1  ;;  %v697_v11 = vsel %vm665_vm8, %v623_v4, %v681_v5  ;;  %vm872_vm8 = vcmask 589312  }
 0x1f7   :  { %v1025_v12 = vpop.f32.mrb[19].mxu1  ;;  %v748_v13 = vsel %vm729_vm1, %v719_v47, 0.0  ;;  %v720_v14 = vmul.f32 %v1343_v16, %v697_v11 }
 0x1f8   :  { %v628_v15 = vadd.f32 %v1023_v9, %v1336_v8  ;;  %v1026_v17 = vadd.f32 %v1025_v12, %v1024_v10  ;;  %749 = vadd.xlane.f32.xlu0 %v748_v13 }
 0x1f9   :  { %v751_v18 = vsel %vm729_vm1, %v720_v14, 0.0 }
 0x1fa   :  { %v682_v19 = vmul.f32 0.1, %v628_v15  ;;  %v631_v20 = vadd.f32 %v1026_v17, %v1336_v8  ;;  %752 = vadd.xlane.f32.xlu1 %v751_v18  ;;  %vm666_vm9 = vcmp.gt.f32.partialorder %v628_v15, 0.0 }
 0x1fc   :  { %v683_v21 = vmul.f32 0.1, %v631_v20  ;;  %v1027_v22 = vpop.f32.mrb[20].mxu1  ;;  %v698_v23 = vsel %vm666_vm9, %v628_v15, %v682_v19  ;;  %vm667_vm10 = vcmp.gt.f32.partialorder %v631_v20, 0.0  ;;  %vm879_vm9 = vcmask 654912  }
 0x1fd   :  { %v1028_v24 = vpop.f32.mrb[21].mxu1  ;;  %v721_v25 = vmul.f32 %v1343_v16, %v698_v23 }
 0x1fe   :  { %v1029_v26 = vadd.f32 %v1028_v24, %v1027_v22  ;;  %v1030_v27 = vpop.f32.mrb[22].mxu1  ;;  %v699_v28 = vsel %vm667_vm10, %v631_v20, %v683_v21  ;;  %vm886_vm10 = vcmask 720512  }
 0x1ff   :  { %v1031_v29 = vpop.f32.mrb[23].mxu1  ;;  %v754_v30 = vsel %vm729_vm1, %v721_v25, 0.0  ;;  %v722_v31 = vmul.f32 %v1343_v16, %v699_v28 }
 0x200   :  { %v636_v32 = vadd.f32 %v1029_v26, %v1336_v8  ;;  %v1032_v33 = vadd.f32 %v1031_v29, %v1030_v27  ;;  %755 = vadd.xlane.f32.xlu0 %v754_v30 }
 0x201   :  { %v757_v34 = vsel %vm729_vm1, %v722_v31, 0.0 }
 0x202   :  { %v684_v35 = vmul.f32 0.1, %v636_v32  ;;  %v639_v36 = vadd.f32 %v1032_v33, %v1336_v8  ;;  %758 = vadd.xlane.f32.xlu1 %v757_v34  ;;  %vm668_vm11 = vcmp.gt.f32.partialorder %v636_v32, 0.0 }
 0x204   :  { %v685_v37 = vmul.f32 0.1, %v639_v36  ;;  %v1033_v38 = vpop.f32.mrb[24].mxu1  ;;  %v700_v39 = vsel %vm668_vm11, %v636_v32, %v684_v35  ;;  %vm669_vm12 = vcmp.gt.f32.partialorder %v639_v36, 0.0  ;;  %vm893_vm11 = vcmask 786112  }
 0x205   :  { %v1034_v40 = vpop.f32.mrb[25].mxu1  ;;  %v723_v43 = vmul.f32 %v1343_v16, %v700_v39 }
 0x206   :  { %v1035_v44 = vadd.f32 %v1034_v40, %v1033_v38  ;;  %v1036_v45 = vpop.f32.mrb[26].mxu1  ;;  %v701_v48 = vsel %vm669_vm12, %v639_v36, %v685_v37  ;;  %vm900_vm12 = vcmask 851712  }
 0x207   :  { %v1037_v49 = vpop.f32.mrb[27].mxu1  ;;  %v760_v50 = vsel %vm729_vm1, %v723_v43, 0.0  ;;  %v724_v51 = vmul.f32 %v1343_v16, %v701_v48 }
 0x208   :  { %v644_v52 = vadd.f32 %v1035_v44, %v1336_v8  ;;  %v1038_v53 = vadd.f32 %v1037_v49, %v1036_v45  ;;  %761 = vadd.xlane.f32.xlu0 %v760_v50 }
 0x209   :  { %v763_v54 = vsel %vm729_vm1, %v724_v51, 0.0 }
 0x20a   :  { %v686_v55 = vmul.f32 0.1, %v644_v52  ;;  %v647_v56 = vadd.f32 %v1038_v53, %v1336_v8  ;;  %764 = vadd.xlane.f32.xlu1 %v763_v54  ;;  %vm670_vm13 = vcmp.gt.f32.partialorder %v644_v52, 0.0 }
 0x20c   :  { %v687_v57 = vmul.f32 0.1, %v647_v56  ;;  %v1039_v58 = vpop.f32.mrb[28].mxu1  ;;  %v702_v59 = vsel %vm670_vm13, %v644_v52, %v686_v55  ;;  %vm671_vm14 = vcmp.gt.f32.partialorder %v647_v56, 0.0  ;;  %vm907_vm13 = vcmask 917312  }
 0x20d   :  { %v1040_v60 = vpop.f32.mrb[29].mxu1  ;;  %v725_v61 = vmul.f32 %v1343_v16, %v702_v59 }
 0x20e   :  { %v1041_v62 = vadd.f32 %v1040_v60, %v1039_v58  ;;  %v1042_v63 = vpop.f32.mrb[30].mxu1  ;;  %v703_v0 = vsel %vm671_vm14, %v647_v56, %v687_v57  ;;  %vm914_vm14 = vcmask 982912  }
 0x20f   :  { %v1043_v1 = vpop.f32.mrb[31].mxu1  ;;  %v766_v2 = vsel %vm729_vm1, %v725_v61, 0.0  ;;  %v726_v3 = vmul.f32 %v1343_v16, %v703_v0 }
 0x210   :  { %v652_v4 = vadd.f32 %v1041_v62, %v1336_v8  ;;  %v1044_v5 = vadd.f32 %v1043_v1, %v1042_v63  ;;  %767 = vadd.xlane.f32.xlu0 %v766_v2 }
 0x211   :  { %v769_v6 = vsel %vm729_vm1, %v726_v3, 0.0 }
 0x212   :  { %v688_v7 = vmul.f32 0.1, %v652_v4  ;;  %v655_v46 = vadd.f32 %v1044_v5, %v1336_v8  ;;  %770 = vadd.xlane.f32.xlu1 %v769_v6  ;;  %vm672_vm15 = vcmp.gt.f32.partialorder %v652_v4, 0.0  ;;  %v1392_v8 = vand.u32 127, %v63_v41 }
 0x214   :  { %v689_v47 = vmul.f32 0.1, %v655_v46  ;;  %v704_v9 = vsel %vm672_vm15, %v652_v4, %v688_v7  ;;  %vm673_vm0 = vcmp.gt.f32.partialorder %v655_v46, 0.0  ;;  %v818_v18 = vadd.s32 4294967288, %v1392_v8 }
 0x215   :  { %v727_v10 = vmul.f32 %v1343_v16, %v704_v9  ;;  %v825_v20 = vadd.s32 4294967280, %v1392_v8  ;;  %v832_v21 = vadd.s32 4294967272, %v1392_v8  ;;  %v839_v23 = vadd.s32 4294967264, %v1392_v8 }
 0x216   :  { %v705_v11 = vsel %vm673_vm0, %v655_v46, %v689_v47  ;;  %v821_v24 = vsub.s32 %v818_v18, %v1290_v42  ;;  %v816_v26 = vsub.s32 %v1392_v8, %v1290_v42  ;;  %v846_v32 = vadd.s32 4294967256, %v1392_v8 }
 0x217   :  { %v772_v12 = vsel %vm729_vm1, %v727_v10, 0.0  ;;  %v728_v13 = vmul.f32 %v1343_v16, %v705_v11  ;;  %v1400_v16 = vstv %s1469_s6  ;;  %v828_v27 = vsub.s32 %v825_v20, %v1290_v42  ;;  %s1120_s6 = smov [#allocation3]  }
 0x218   :  { %773 = vadd.xlane.f32.xlu0 %v772_v12  ;;  %v835_v30 = vsub.s32 %v832_v21, %v1290_v42  ;;  %v842_v33 = vsub.s32 %v839_v23, %v1290_v42  ;;  %v853_v36 = vadd.s32 4294967248, %v1392_v8  ;;  %v860_v40 = vadd.s32 4294967240, %v1392_v8  ;;  %s931_s13 = sshll.u32 %s1120_s6, 4  ;;  %s932_s13 = int_to_ptr.vmem [resolvable:$true] %s931_s13 }
 0x219   :  { %v775_v14 = vsel %vm729_vm1, %v728_v13, 0.0  ;;  %vm823_vm1 = vcmask 130112   ;;  %v849_v45 = vsub.s32 %v846_v32, %v1290_v42  ;;  %v867_v53 = vadd.s32 4294967232, %v1392_v8  ;;  %s1095_s14 = scalar_lea.vmem %s932_s13, 16  ;;  %s1099_s15 = scalar_lea.vmem %s932_s13, 32 }
 0x21a   :  { %776 = vadd.xlane.f32.xlu1 %v775_v14  ;;  %v856_v50 = vsub.s32 %v853_v36, %v1290_v42  ;;  %v863_v57 = vsub.s32 %v860_v40, %v1290_v42  ;;  %v874_v58 = vadd.s32 4294967224, %v1392_v8  ;;  %v881_v62 = vadd.s32 4294967216, %v1392_v8  ;;  %p1096_p0 = scmp.ne.s32.totalorder %s932_s13, %s1095_s14  ;;  %p1100_p1 = scmp.lt.s32.totalorder %s932_s13, %s932_s13 }
 0x21b   :  { %v870_v1 = vsub.s32 %v867_v53, %v1290_v42  ;;  %v888_v6 = vadd.s32 4294967208, %v1392_v8  ;;  %v895_v14 = vadd.s32 4294967200, %v1392_v8  ;;  %v902_v21 = vadd.s32 4294967192, %v1392_v8  ;;  %p1101_p2 = scmp.lt.s32.totalorder %s1099_s15, %s1095_s14 }
 0x21c   :  { %v877_v5 = vsub.s32 %v874_v58, %v1290_v42  ;;  %v884_v9 = vsub.s32 %v881_v62, %v1290_v42  ;;  %vm921_vm15 = vcmask 1048512  }
 0x21d   :  { %p1102_p3 = por %p1101_p2, %p1100_p1 }
 0x21f   :  { %p1103_p4 = pnand %p1102_p3, %p1096_p0 }
 0x26d   :  { %v732_v15 = vpop.xlane.xlu0 %731 }
 0x26e   :  { %v780_v29 = vadd.f32 %v1400_v16, %v732_v15  ;;  %v891_v15 = vsub.s32 %v888_v6, %v1290_v42 }
 0x270   :  { %v817_v43 = vrot.slane %v780_v29, %v816_v26  ;;  %v909_v26 = vadd.s32 4294967184, %v1392_v8  ;;  %v905_v29 = vsub.s32 %v902_v21, %v1290_v42 }
 0x271   :  { %v735_v19 = vpop.xlane.xlu0 %734 }
 0x272   :  { %v781_v41 = vadd.f32 %v1400_v16, %v735_v19 }
 0x274   :  { %v822_v37 = vrot.slane %v781_v41, %v821_v24  ;;  %v898_v24 = vsub.s32 %v895_v14, %v1290_v42 }
 0x275   :  { %v738_v17 = vpop.xlane.xlu1 %737 }
 0x276   :  { %v782_v28 = vadd.f32 %v1400_v16, %v738_v17  ;;  %v824_v54 = vsel %vm823_vm1, %v822_v37, %v817_v43 }
 0x278   :  { %v829_v39 = vrot.slane %v782_v28, %v828_v27 }
 0x279   :  { %v741_v22 = vpop.xlane.xlu1 %740 }
 0x27a   :  { %v783_v31 = vadd.f32 %v1400_v16, %v741_v22  ;;  %v831_v56 = vsel %vm830_vm2, %v829_v39, %v824_v54 }
 0x27c   :  { %v836_v44 = vrot.slane %v783_v31, %v835_v30 }
 0x27d   :  { %v744_v25 = vpop.xlane.xlu0 %743 }
 0x27e   :  { %v784_v34 = vadd.f32 %v1400_v16, %v744_v25  ;;  %v838_v59 = vsel %vm837_vm3, %v836_v44, %v831_v56 }
 0x27f   :  { %v747_v35 = vpop.xlane.xlu1 %746 }
 0x280   :  { %v785_v48 = vadd.f32 %v1400_v16, %v747_v35  ;;  %v843_v49 = vrot.slane %v784_v34, %v842_v33  ;;  %v916_v33 = vadd.s32 4294967176, %v1392_v8  ;;  %v912_v34 = vsub.s32 %v909_v26, %v1290_v42 }
 0x282   :  { %v850_v60 = vrot.slane %v785_v48, %v849_v45  ;;  %v845_v63 = vsel %vm844_vm4, %v843_v49, %v838_v59  ;;  %v919_v40 = vsub.s32 %v916_v33, %v1290_v42 }
 0x284   :  { %v852_v7 = vsel %vm851_vm5, %v850_v60, %v845_v63 }
 0x285   :  { %v750_v38 = vpop.xlane.xlu0 %749 }
 0x286   :  { %v786_v51 = vadd.f32 %v1400_v16, %v750_v38 }
 0x287   :  { %v753_v52 = vpop.xlane.xlu1 %752 }
 0x288   :  { %v787_v61 = vadd.f32 %v1400_v16, %v753_v52  ;;  %v857_v0 = vrot.slane %v786_v51, %v856_v50 }
 0x28a   :  { %v864_v46 = vrot.slane %v787_v61, %v863_v57  ;;  %v859_v10 = vsel %vm858_vm6, %v857_v0, %v852_v7 }
 0x28c   :  { %v866_v17 = vsel %vm865_vm7, %v864_v46, %v859_v10 }
 0x28d   :  { %v756_v55 = vpop.xlane.xlu0 %755 }
 0x28e   :  { %v788_v2 = vadd.f32 %v1400_v16, %v756_v55 }
 0x28f   :  { %v759_v3 = vpop.xlane.xlu1 %758 }
 0x290   :  { %v789_v47 = vadd.f32 %v1400_v16, %v759_v3  ;;  %v871_v11 = vrot.slane %v788_v2, %v870_v1 }
 0x292   :  { %v878_v18 = vrot.slane %v789_v47, %v877_v5  ;;  %v873_v22 = vsel %vm872_vm8, %v871_v11, %v866_v17 }
 0x294   :  { %v880_v27 = vsel %vm879_vm9, %v878_v18, %v873_v22 }
 0x295   :  { %v762_v4 = vpop.xlane.xlu0 %761 }
 0x296   :  { %v790_v12 = vadd.f32 %v1400_v16, %v762_v4 }
 0x297   :  { %v765_v13 = vpop.xlane.xlu1 %764 }
 0x298   :  { %v791_v19 = vadd.f32 %v1400_v16, %v765_v13  ;;  %v885_v23 = vrot.slane %v790_v12, %v884_v9 }
 0x29a   :  { %v892_v28 = vrot.slane %v791_v19, %v891_v15  ;;  %v887_v31 = vsel %vm886_vm10, %v885_v23, %v880_v27 }
 0x29c   :  { %v894_v35 = vsel %vm893_vm11, %v892_v28, %v887_v31 }
 0x29d   :  { %v768_v20 = vpop.xlane.xlu0 %767 }
 0x29e   :  { %v792_v41 = vadd.f32 %v1400_v16, %v768_v20 }
 0x29f   :  { %v771_v25 = vpop.xlane.xlu1 %770 }
 0x2a0   :  { %v793_v30 = vadd.f32 %v1400_v16, %v771_v25  ;;  %v899_v32 = vrot.slane %v792_v41, %v898_v24 }
 0x2a2   :  { %v906_v36 = vrot.slane %v793_v30, %v905_v29  ;;  %v901_v38 = vsel %vm900_vm12, %v899_v32, %v894_v35 }
 0x2a4   :  { %v908_v8 = vsel %vm907_vm13, %v906_v36, %v901_v38 }
 0x2a5   :  { %v774_v37 = vpop.xlane.xlu0 %773 }
 0x2a6   :  { %v794_v39 = vadd.f32 %v1400_v16, %v774_v37 }
 0x2a7   :  { %v777_v43 = vpop.xlane.xlu1 %776 }
 0x2a8   :  { %v913_v44 = vrot.slane %v794_v39, %v912_v34  ;;  %v795_v45 = vadd.f32 %v1400_v16, %v777_v43 }
 0x2aa   :  { %v920_v48 = vrot.slane %v795_v45, %v919_v40  ;;  %v915_v49 = vsel %vm914_vm14, %v913_v44, %v908_v8 }
 0x2ac   :  { %v922_v50 = vsel %vm921_vm15, %v920_v48, %v915_v49 }
 0x2ad   :  { %924 = vst [vmem:[#allocation3] sm:$0x1] %v922_v50 }
 0x2ae   :  { %1106 = shalt.err (!%p1103_p4)
}
 0x2af   :  { %s1107_s18 = scalar_lea.hbm %s1470_s7, 16 }
 0x2b0   :  { %p1108_p5 = scmp.ne.s32.totalorder %s1470_s7, %s1107_s18  ;;  %p1111_p6 = scmp.lt.u32.totalorder %s1107_s18, %s1470_s7 }
 0x2b2   :  { %p1113_p7 = pnand %p1111_p6, %p1108_p5 }
 0x2b4   :  { %1116 = shalt.err (!%p1113_p7)
}
 0x2b5   :  { %934 = dma.vmem_to_hbm [thread:$0]  %s932_s13, 16, %s1470_s7, [#allocation4]  }
 0x2b6   :  { %1117 = dma.done.wait [#allocation4], 16  }
 0x2b7   :  { %1118 = vsyncadd [#allocation4], 4294967280 }
 0x2b8   :  { %938 = vsyncpa [#allocation4], 1 }

</bundles_post_ra>
